<compile_context>
chip_gen: v7x
topology: tpu7x:2x2x1
jax: 0.10.0
libtpu: 0.0.40
codegen_flags: <defaults>
</compile_context>

<pallas_src>
import jax
import jax.numpy as jnp
from jax import lax
from jax.experimental import pallas as pl
from jax.experimental.pallas import tpu as pltpu

SEQ_LEN = 21  # hardcoded in the PyTorch forward


def _id_add_kernel(x_ref, e_ref, o_ref):
    # x_ref: (pt, rt, D)   e_ref: (pt, D)   o_ref: (pt, rt, D)
    # Pure broadcast-add in the I/O dtype (renorm already done in the wrapper).
    e = e_ref[...]                       # (pt, D)
    o_ref[...] = x_ref[...] + e[:, None, :]


def _pick_block(dim, sub_unit, max_elems):
    """Block size along `dim`: full dim if it fits in `max_elems`, else the
    largest divisor of `dim` that is a multiple of `sub_unit` (TPU sublane
    tiling) and <= max_elems; falls back to the full dim if none exists."""
    if dim <= max_elems:
        return dim
    best = 0
    d = sub_unit
    while d <= max_elems:
        if dim % d == 0:
            best = d
        d += sub_unit
    return best if best > 0 else dim


def learned_id_encoding(x, emb_table, num_people, seq_len=SEQ_LEN):
    """x: [num_people*seq_len, B, D]; emb_table: [1000, D]."""
    N, B, D = x.shape
    P = int(num_people)
    assert N == P * seq_len, "x leading dim must be num_people * seq_len"
    R = seq_len * B  # rows per person after flattening (seq, batch)

    # ---- wrapper-side glue (tiny, fusion-friendly) -------------------------
    # Contiguous prefix slice instead of an XLA gather.
    rows = lax.slice(emb_table, (0, 0), (P, D))                   # [P, D]
    # Embedding max_norm renorm (max_norm=True -> 1.0, eps=1e-7), in f32.
    rows_f32 = rows.astype(jnp.float32)
    norm = jnp.sqrt(jnp.sum(rows_f32 * rows_f32, axis=-1, keepdims=True))
    scale = jnp.where(norm > 1.0, 1.0 / (norm + 1e-7), 1.0)
    rows = (rows_f32 * scale).astype(x.dtype)                     # [P, D]

    x_r = x.reshape(P, R, D)

    # ---- shape-adaptive tiling --------------------------------------------
    itemsize = jnp.dtype(x.dtype).itemsize
    target_block_bytes = 1 << 20  # ~1 MiB x-block; 4x double-buffered << VMEM
    max_rows = max(8, target_block_bytes // max(D * itemsize, 1))
    rt = _pick_block(R, 8, max_rows)
    max_people = max(1, target_block_bytes // max(rt * D * itemsize, 1))
    pt = _pick_block(P, 8, max_people)

    grid = (P // pt, R // rt)

    out = pl.pallas_call(
        _id_add_kernel,
        out_shape=jax.ShapeDtypeStruct((P, R, D), x.dtype),
        grid=grid,
        in_specs=[
            pl.BlockSpec((pt, rt, D), lambda p, r: (p, r, 0)),
            pl.BlockSpec((pt, D), lambda p, r: (p, 0)),
        ],
        out_specs=pl.BlockSpec((pt, rt, D), lambda p, r: (p, r, 0)),
        compiler_params=pltpu.CompilerParams(
            dimension_semantics=("parallel", "parallel"),
        ),
    )(x_r, rows)

    # TODO(synk): nn.Dropout(p=0.1) omitted (eval/inference mode -> identity).
    return out.reshape(N, B, D)


def _reference(x, emb_table, num_people, seq_len=SEQ_LEN):
    idx = jnp.repeat(jnp.arange(num_people), seq_len)             # [N]
    e = emb_table[idx]                                            # [N, D]
    norm = jnp.linalg.norm(e, axis=-1, keepdims=True)
    scale = jnp.where(norm > 1.0, 1.0 / (norm + 1e-7), 1.0)
    e = e * scale
    return x + e[:, None, :]


if __name__ == "__main__":
    key = jax.random.PRNGKey(0)
    k_x, k_emb = jax.random.split(key)

    d_model = 32
    num_people = 2
    batch = 2
    N = num_people * SEQ_LEN                                      # 42

    # Deterministic synthetic params / inputs (nn.Embedding default ~ N(0,1)).
    x = jax.random.normal(k_x, (N, batch, d_model), dtype=jnp.float32)
    emb_table = jax.random.normal(k_emb, (1000, d_model), dtype=jnp.float32)

    out = learned_id_encoding(x, emb_table, num_people)
    out = jax.block_until_ready(out)

    ref = _reference(x, emb_table, num_people)
    assert out.shape == (N, batch, d_model)
    assert jnp.allclose(out, ref, atol=1e-5, rtol=1e-5), "mismatch vs reference"

    print("KERNEL_OK")
</pallas_src>

<mosaic_0001>
module attributes {stable_mosaic.version = 11 : i64} {
  func.func @_id_add_kernel(%arg0: i32, %arg1: i32, %arg2: memref<2x42x32xf32, #tpu.memory_space<vmem>>, %arg3: memref<2x32xf32, #tpu.memory_space<vmem>>, %arg4: memref<2x42x32xf32, #tpu.memory_space<vmem>>) attributes {dimension_semantics = [#tpu.dimension_semantics<parallel>, #tpu.dimension_semantics<parallel>], iteration_bounds = array<i64: 1, 1>, scalar_prefetch = 0 : i64, scratch_operands = 0 : i64, tpu.core_type = #tpu.core_type<tc>, window_params = [{transform_indices = @transform_0, window_bounds = array<i64: 2, 42, 32>}, {transform_indices = @transform_1, window_bounds = array<i64: 2, 32>}, {transform_indices = @transform_2, window_bounds = array<i64: 2, 42, 32>}]} {
    %c0 = arith.constant 0 : index
    %c0_0 = arith.constant 0 : index
    %0 = vector.load %arg3[%c0, %c0_0] : memref<2x32xf32, #tpu.memory_space<vmem>>, vector<2x32xf32>
    %c0_1 = arith.constant 0 : index
    %c0_2 = arith.constant 0 : index
    %c0_3 = arith.constant 0 : index
    %1 = vector.load %arg2[%c0_1, %c0_2, %c0_3] : memref<2x42x32xf32, #tpu.memory_space<vmem>>, vector<2x42x32xf32>
    %2 = vector.shape_cast %0 : vector<2x32xf32> to vector<2x1x32xf32>
    %3 = vector.broadcast %2 : vector<2x1x32xf32> to vector<2x42x32xf32>
    %4 = arith.addf %1, %3 : vector<2x42x32xf32>
    %c0_4 = arith.constant 0 : index
    %c0_5 = arith.constant 0 : index
    %c0_6 = arith.constant 0 : index
    %5 = vector.load %arg4[%c0_4, %c0_5, %c0_6] : memref<2x42x32xf32, #tpu.memory_space<vmem>>, vector<2x42x32xf32>
    tpu.vector_store %arg4[%c0_4, %c0_5, %c0_6], %4 {strides = array<i32>} : memref<2x42x32xf32, #tpu.memory_space<vmem>>, vector<2x42x32xf32>,
    return
  }
  func.func @transform_0(%arg0: i32, %arg1: i32) -> (i32, i32, i32) {
    %c0_i32 = arith.constant 0 : i32
    %c0_i32_0 = arith.constant 0 : i32
    return %arg0, %arg1, %c0_i32 : i32, i32, i32
  }
  func.func @transform_1(%arg0: i32, %arg1: i32) -> (i32, i32) {
    %c0_i32 = arith.constant 0 : i32
    %c0_i32_0 = arith.constant 0 : i32
    return %arg0, %c0_i32 : i32, i32
  }
  func.func @transform_2(%arg0: i32, %arg1: i32) -> (i32, i32, i32) {
    %c0_i32 = arith.constant 0 : i32
    %c0_i32_0 = arith.constant 0 : i32
    return %arg0, %arg1, %c0_i32 : i32, i32, i32
  }
}

</mosaic_0001>

<bundles_post_ra>
// kernel: tpu_custom_call.1
= control target key start
LH: loop header
LB: loop body
LE: loop exit
PB: predicated region body
PF: predicated region fallthrough
CT: control target
= control target key end

     0   :  { %v36_v0 = vlaneseq  ;;  %v89_v2 = vmov 1966171168   ;;  %vm69_vm0 = vcmask 261120   ;;  %vm75_vm1 = vcmask 254976   ;;  %s192_s1 = inlined_call_operand.vmem [shape: f32[2,32], index: 1, kind: input, shape index: {}]   ;;  %s193_s0 = inlined_call_operand.vmem [shape: f32[2,42,32], index: 0, kind: input, shape index: {}]   ;;  %s194_s2 = inlined_call_operand.vmem [shape: f32[2,42,32], index: 2, kind: output, shape index: {}]  }
   0x1   :  { %v87_v1 = vld.sshfl [vmem:[%s192_s1] sm:$0x11 pattern:$0x75316420]  ;;  %v34_v3 = vunpack.c.l.s4 %v89_v2  ;;  %v13_v11 = vld [vmem:[%s193_s0 + $0x8] sm:$0xff]  ;;  %v14_v12 = vld [vmem:[%s193_s0 + $0x10] sm:$0xff] }
   0x2   :  { %v37_v4 = vshrl.u32 %v36_v0, 7  ;;  %v32_v6 = vcombine.high %v87_v1, %v87_v1  ;;  %v12_v9 = vld [vmem:[%s193_s0] sm:$0xff]  ;;  %v15_v14 = vld [vmem:[%s193_s0 + $0x18] sm:$0xff]  ;;  %v17_v16 = vld [vmem:[%s193_s0 + $0x28] sm:$0x3] }
   0x3   :  { %v35_v5 = vunpack.c.0.s8 %v34_v3  ;;  %v16_v15 = vld [vmem:[%s193_s0 + $0x20] sm:$0xff]  ;;  %v18_v18 = vld [vmem:[%s193_s0 + $0x30] sm:$0xff]  ;;  %v19_v20 = vld [vmem:[%s193_s0 + $0x38] sm:$0xff] }
   0x4   :  { %v49_v8 = vsub.s32 0, %v37_v4  ;;  %v20_v21 = vld [vmem:[%s193_s0 + $0x40] sm:$0xff]  ;;  %v21_v22 = vld [vmem:[%s193_s0 + $0x48] sm:$0xff]  ;;  %v22_v23 = vld [vmem:[%s193_s0 + $0x50] sm:$0xff] }
   0x5   :  { %v38_v7 = vsub.s32 %v35_v5, %v37_v4  ;;  %v23_v24 = vld [vmem:[%s193_s0 + $0x58] sm:$0x3] }
   0x7   :  { %v39_v10 = vrot.slane %v87_v1, %v38_v7  ;;  %v46_v13 = vrot.slane %v32_v6, %v38_v7 }
   0x9   :  { %v50_v17 = vrot.slane %v39_v10, %v49_v8  ;;  %v54_v19 = vrot.slane %v46_v13, %v49_v8 }
   0xb   :  { %v57_v25 = vadd.f32 %v50_v17, %v12_v9  ;;  %v58_v26 = vadd.f32 %v50_v17, %v13_v11  ;;  %v59_v27 = vadd.f32 %v50_v17, %v14_v12  ;;  %v60_v28 = vadd.f32 %v50_v17, %v15_v14 }
   0xc   :  { %v61_v29 = vadd.f32 %v50_v17, %v16_v15  ;;  %v62_v30 = vadd.f32 %v50_v17, %v17_v16  ;;  %v63_v31 = vadd.f32 %v54_v19, %v18_v18  ;;  %v64_v32 = vadd.f32 %v54_v19, %v19_v20 }
   0xd   :  { %70 = vst.msk [vmem:[%s194_s2] sm:$0xff] %vm69_vm0, %v57_v25  ;;  %71 = vst.msk [vmem:[%s194_s2 + $0x8] sm:$0xff] %vm69_vm0, %v58_v26  ;;  %v65_v33 = vadd.f32 %v54_v19, %v20_v21  ;;  %v66_v34 = vadd.f32 %v54_v19, %v21_v22  ;;  %v67_v35 = vadd.f32 %v54_v19, %v22_v23 }
   0xe   :  { %72 = vst.msk [vmem:[%s194_s2 + $0x10] sm:$0xff] %vm69_vm0, %v59_v27  ;;  %73 = vst.msk [vmem:[%s194_s2 + $0x18] sm:$0xff] %vm69_vm0, %v60_v28  ;;  %v68_v36 = vadd.f32 %v54_v19, %v23_v24 }
   0xf   :  { %74 = vst.msk [vmem:[%s194_s2 + $0x20] sm:$0xff] %vm69_vm0, %v61_v29  ;;  %77 = vst.msk [vmem:[%s194_s2 + $0x30] sm:$0xff] %vm69_vm0, %v63_v31 }
  0x10   :  { %76 = vst.msk [vmem:[%s194_s2 + $0x28] sm:$0x3] %vm75_vm1, %v62_v30  ;;  %82 = vst.msk [vmem:[%s194_s2 + $0x58] sm:$0x3] %vm75_vm1, %v68_v36 }
  0x11   :  { %78 = vst.msk [vmem:[%s194_s2 + $0x38] sm:$0xff] %vm69_vm0, %v64_v32  ;;  %79 = vst.msk [vmem:[%s194_s2 + $0x40] sm:$0xff] %vm69_vm0, %v65_v33 }
  0x12   :  { %80 = vst.msk [vmem:[%s194_s2 + $0x48] sm:$0xff] %vm69_vm0, %v66_v34  ;;  %81 = vst.msk [vmem:[%s194_s2 + $0x50] sm:$0xff] %vm69_vm0, %v67_v35 }

</bundles_post_ra>
